<compile_context>
chip_gen: v5e
topology: v5e:2x2
jax: 0.10.0
libtpu: 0.0.40
codegen_flags: <defaults>
</compile_context>

<pallas_src>
import jax
import jax.numpy as jnp
from jax import lax
from jax.experimental import pallas as pl
from jax.experimental.pallas import tpu as pltpu


# ----------------------------------------------------------------------------
# Kernel
# ----------------------------------------------------------------------------
def net_kernel(x3_ref, ch3_ref, w1_ref, b1_ref, w2_ref, b2_ref, w3_ref, b3_ref,
               wfc1_ref, bfc1_ref, wfc2_ref, bfc2_ref, wfc3_ref, bfc3_ref,
               out_ref):
    """One batch tile of the fused Net.forward.

    x3_ref:  (TB*L, 3) raw channels-last input rows, lanes = [ch1, ch2, ch4].
    ch3_ref: (TB, 1)   scalar channel3 feature.
    Everything downstream is branch-fused on the lane axis: 3x32 = 96 lanes
    after conv*_1, 3x64 = 192 lanes after conv*_2; (batch, length) rows are
    flattened onto the sublane axis (row = b*L + l).
    """
    M = x3_ref.shape[0]                 # TB * L
    TB = ch3_ref.shape[0]
    L = M // TB
    f32 = jnp.float32
    mxu_dt = w2_ref.dtype               # f32 (default) or bf16 (opt-in)

    # ---- (M, 1) per-row index masks (l = row % L) --------------------------
    # These also stop the sublane rolls below from leaking data across batch
    # rows and across the tile boundary, which keeps ragged last tiles safe.
    l_idx = lax.broadcasted_iota(jnp.int32, (M, 1), 0) % L
    first = l_idx == 0                  # l == 0
    last = l_idx == (L - 1)             # l == L-1
    even = (l_idx & 1) == 0             # l even (L is asserted even)

    def shift_down(a):                  # a[r] <- a[r-1], zeroed where l == 0
        return jnp.where(first, 0.0, pltpu.roll(a, shift=1, axis=0))

    def shift_up(a):                    # a[r] <- a[r+1], zeroed where l == L-1
        return jnp.where(last, 0.0, pltpu.roll(a, shift=a.shape[0] - 1, axis=0))

    # ---- conv*_1 (1 -> 32, k=3, pad=1), all 3 branches at once, + ReLU -----
    # Three accumulated block-diagonal matmuls (tap k = 0/1/2); no broadcast
    # copies of the input are materialized.
    x = x3_ref[...].astype(mxu_dt)      # (M, 3)
    xm = shift_down(x)                  # x[l-1]
    xp = shift_up(x)                    # x[l+1]
    h1 = (jnp.dot(xm, w1_ref[0], preferred_element_type=f32)
          + jnp.dot(x, w1_ref[1], preferred_element_type=f32)
          + jnp.dot(xp, w1_ref[2], preferred_element_type=f32)
          + b1_ref[...])
    h1 = jnp.maximum(h1, 0.0)           # (M, 96)

    # ---- conv*_2 (32 -> 64, k=3, pad=1): three accumulated block-diagonal
    #      matmuls (no (M, 288) tap concat). ---------------------------------
    h1 = h1.astype(mxu_dt)
    h1m = shift_down(h1)
    h1p = shift_up(h1)
    h2 = (jnp.dot(h1m, w2_ref[0], preferred_element_type=f32)
          + jnp.dot(h1, w2_ref[1], preferred_element_type=f32)
          + jnp.dot(h1p, w2_ref[2], preferred_element_type=f32)
          + b2_ref[...])
    h2 = jnp.maximum(h2, 0.0)           # (M, 192)

    # ---- MaxPool1d(2,2) + AdaptiveAvgPool1d(1) fused into one reduction ----
    # mean_j max(e_j, o_j) = (1/L) * sum_l [ h2[l] + 1{l even} |h2[l]-h2[l+1]| ]
    # The roll wraps across rows / the tile end, but l = L-1 is odd (L even),
    # so those rows are masked off by `even`.
    nxt = pltpu.roll(h2, shift=M - 1, axis=0)                   # h2[r+1]
    pooled = h2 + jnp.where(even, jnp.abs(h2 - nxt), 0.0)
    feat = jnp.sum(pooled.reshape(TB, L, 192), axis=1) * (1.0 / L)   # (TB, 192)

    # ---- channel3: Linear(1, 32) + ReLU (AdaptiveAvgPool over len-1 = id) --
    f3 = jnp.maximum(ch3_ref[...] * w3_ref[...] + b3_ref[...], 0.0)  # (TB, 32)

    # ---- MLP head; fc1 weight rows were pre-permuted so the input order is
    #      [branch1, branch2, branch4, channel3], matching `feat ++ f3`. -----
    combined = jnp.concatenate([feat, f3], axis=-1).astype(mxu_dt)   # (TB, 224)
    h = jnp.dot(combined, wfc1_ref[...], preferred_element_type=f32) + bfc1_ref[...]
    h = jnp.maximum(h, 0.0).astype(mxu_dt)                           # (TB, 120)
    h = jnp.dot(h, wfc2_ref[...], preferred_element_type=f32) + bfc2_ref[...]
    h = jnp.maximum(h, 0.0).astype(mxu_dt)                           # (TB, 84)

    # Final Linear(84, 1), produced directly lane-dense as a (1, TB) block.
    out = jnp.einsum('oj,bj->ob', wfc3_ref[...], h,
                     preferred_element_type=f32)                     # (1, TB)
    out_ref[...] = out + bfc3_ref[...]


# ----------------------------------------------------------------------------
# Parameter construction (PyTorch shapes) and fused-layout packing
# ----------------------------------------------------------------------------
def init_params(key):
    """Deterministic synthetic parameters using the nn.Module's shapes."""
    shapes = {
        'conv1_1_w': (32, 1, 3),  'conv1_1_b': (32,),
        'conv1_2_w': (64, 32, 3), 'conv1_2_b': (64,),
        'conv2_1_w': (32, 1, 3),  'conv2_1_b': (32,),
        'conv2_2_w': (64, 32, 3), 'conv2_2_b': (64,),
        'fc_ch3_w':  (32, 1),     'fc_ch3_b':  (32,),
        'conv4_1_w': (32, 1, 3),  'conv4_1_b': (32,),
        'conv4_2_w': (64, 32, 3), 'conv4_2_b': (64,),
        'fc1_w':     (120, 224),  'fc1_b':     (120,),
        'fc2_w':     (84, 120),   'fc2_b':     (84,),
        'fc3_w':     (1, 84),     'fc3_b':     (1,),
    }
    # NOTE: self.conv3 is declared in __init__ but never used in forward().
    keys = jax.random.split(key, len(shapes))
    params = {}
    for (name, shape), k in zip(shapes.items(), keys):
        scale = 0.1 if name.endswith('_w') else 0.01
        params[name] = jax.random.normal(k, shape, dtype=jnp.float32) * scale
    return params


def pack_params(p):
    """Convert PyTorch-shaped parameters into the fused kernel layout."""
    branches = ('1', '2', '4')

    # conv*_1: (32,1,3) each -> per-tap block-diagonal (3, 3, 96)
    #   w1c[k, bi, 32*bi + co] = conv{bi}_1_w[co, 0, k]
    w1c = jnp.zeros((3, 3, 96), jnp.float32)
    # conv*_2: (64,32,3) each -> per-tap block-diagonal (3, 96, 192)
    #   w2c[k, 32*bi + ci, 64*bi + co] = conv{bi}_2_w[co, ci, k]
    w2c = jnp.zeros((3, 96, 192), jnp.float32)
    b1_list, b2_list = [], []
    for bi, b in enumerate(branches):
        w1 = p[f'conv{b}_1_w']                                  # (32, 1, 3)
        w1c = w1c.at[:, bi, 32 * bi:32 * (bi + 1)].set(
            jnp.transpose(w1[:, 0, :]))                         # (3, 32) [k, co]
        b1_list.append(p[f'conv{b}_1_b'])
        w2 = p[f'conv{b}_2_w']                                  # (64, 32, 3)
        w2c = w2c.at[:, 32 * bi:32 * (bi + 1), 64 * bi:64 * (bi + 1)].set(
            jnp.transpose(w2, (2, 1, 0)))                       # (3, ci, co)
        b2_list.append(p[f'conv{b}_2_b'])
    b1c = jnp.concatenate(b1_list).reshape(1, 96)
    b2c = jnp.concatenate(b2_list).reshape(1, 192)

    # channel3 Linear(1, 32)
    w3 = jnp.transpose(p['fc_ch3_w'])                           # (1, 32)
    b3 = p['fc_ch3_b'].reshape(1, 32)

    # fc1: permute input rows so it consumes [f1, f2, f4, f3] directly
    # (PyTorch order is [f1, f2, f3, f4]).
    perm = jnp.concatenate([jnp.arange(0, 128), jnp.arange(160, 224),
                            jnp.arange(128, 160)])
    wfc1 = jnp.transpose(p['fc1_w'])[perm, :]                   # (224, 120)
    bfc1 = p['fc1_b'].reshape(1, -1)
    wfc2 = jnp.transpose(p['fc2_w'])                            # (120, 84)
    bfc2 = p['fc2_b'].reshape(1, -1)
    wfc3 = p['fc3_w']                                           # (1, 84)
    bfc3 = p['fc3_b'].reshape(1, 1)

    return (w1c, b1c, w2c, b2c, w3, b3, wfc1, bfc1, wfc2, bfc2, wfc3, bfc3)


def _const_spec(arr):
    # Weights/biases: full-array block, constant block index -> stays resident.
    return pl.BlockSpec(tuple(arr.shape), lambda i, nd=arr.ndim: (0,) * nd)


def _pick_tb(B, L, vmem_budget):
    """Batch tile size: either the full B or a multiple of 128 (so the
    lane-dense (1, tb) output block and the (tb*L, 3)/(tb, 1) input blocks
    satisfy the (8, 128) tiling rules)."""
    # Live f32 intermediates per (b, l) row: x taps (3x3) + h1 taps (3x96)
    # + h2/nxt/pooled (3x192) lanes  ->  ~3.5 KiB / row.
    bytes_per_row = 4 * (3 * 3 + 3 * 96 + 3 * 192)
    fit = max(1, vmem_budget // max(1, L * bytes_per_row))
    if fit >= B and B < 256:
        return B                            # one tile; batch too small to split
    target = min(fit, pl.cdiv(B, 2))        # >= 2 tiles so v7x's 2nd TC has work
    tb = (target // 128) * 128
    if tb == 0:
        # TODO(synk): add an L-axis grid for very long sequences; for now fall
        # back to a 128-row batch tile and let the compiler spill if needed.
        return min(B, 128)
    return min(tb, B)


# ----------------------------------------------------------------------------
# Wrapper
# ----------------------------------------------------------------------------
def net_forward(channel1, channel2, channel3, channel4, params, *,
                tb=None, use_bf16_matmul=False):
    """Equivalent of Net.forward((channel1, channel2, channel3, channel4)).

    use_bf16_matmul=True casts MXU operands to bf16 (f32 accumulation) for
    ~3x fewer MXU passes on v6e/v7x; expect ~1e-3..1e-2 relative drift vs
    the f32 PyTorch module.  Default keeps everything f32.
    """
    B, L = channel1.shape
    assert L % 2 == 0, "MaxPool1d(2,2)+mean fusion assumes an even sequence length"

    # VMEM limit: ~3/4 of the chip's VMEM, capped at 100 MiB (v5e/v6e: 128 MiB
    # -> 96/100 MiB; v7x: 64 MiB -> 48 MiB).  Fallback keeps v7x safe.
    try:
        info = pltpu.get_tpu_info()
        vmem_limit = min(int(info.vmem_capacity_bytes) * 3 // 4, 100 << 20)
    except Exception:
        vmem_limit = 48 << 20

    if tb is None:
        tb = _pick_tb(B, L, vmem_limit // 2)
    tb = max(1, min(tb, B))
    if tb != B and tb % 128 != 0:           # keep the output block lane-legal
        tb = max(128, (tb // 128) * 128)
        if tb >= B:
            tb = B

    # Channels-last raw input: rows = (b, l), lanes = [ch1, ch2, ch4].
    x3 = jnp.stack([channel1.astype(jnp.float32).reshape(-1),
                    channel2.astype(jnp.float32).reshape(-1),
                    channel4.astype(jnp.float32).reshape(-1)], axis=-1)  # (B*L, 3)
    ch3_2d = channel3.astype(jnp.float32).reshape(B, 1)    # torch: .view(-1, 1)

    packed = pack_params(params)
    if use_bf16_matmul:
        (w1c, b1c, w2c, b2c, w3, b3,
         wfc1, bfc1, wfc2, bfc2, wfc3, bfc3) = packed
        w1c, w2c, wfc1, wfc2, wfc3 = (a.astype(jnp.bfloat16)
                                      for a in (w1c, w2c, wfc1, wfc2, wfc3))
        packed = (w1c, b1c, w2c, b2c, w3, b3,
                  wfc1, bfc1, wfc2, bfc2, wfc3, bfc3)

    grid = (pl.cdiv(B, tb),)
    in_specs = ([pl.BlockSpec((tb * L, 3), lambda i: (i, 0)),   # stacked ch1/2/4
                 pl.BlockSpec((tb, 1), lambda i: (i, 0))]       # channel3
                + [_const_spec(w) for w in packed])
    out_specs = pl.BlockSpec((1, tb), lambda i: (0, i))         # lane-dense output

    flops = int(B * L * (2 * 3 * 3 * 96 + 2 * 3 * 96 * 192)
                + B * 2 * (224 * 120 + 120 * 84 + 84))
    bytes_accessed = int(4 * (3 * B * L + 2 * B)
                         + sum(int(w.size) * w.dtype.itemsize for w in packed))

    out = pl.pallas_call(
        net_kernel,
        grid=grid,
        in_specs=in_specs,
        out_specs=out_specs,
        out_shape=jax.ShapeDtypeStruct((1, B), jnp.float32),
        compiler_params=pltpu.CompilerParams(
            dimension_semantics=("parallel",),      # batch tiles are independent
            vmem_limit_bytes=vmem_limit),
        cost_estimate=pl.CostEstimate(flops=flops, transcendentals=0,
                                      bytes_accessed=bytes_accessed),
    )(x3, ch3_2d, *packed)
    return out[0]                                   # torch: output.squeeze(-1)


# ----------------------------------------------------------------------------
# Pure-JAX reference (PyTorch semantics) for validation
# ----------------------------------------------------------------------------
def net_reference(ch1, ch2, ch3, ch4, p):
    hi = lax.Precision.HIGHEST

    def conv1d(x, w, b):              # x (B,Cin,L), w (Cout,Cin,3), padding=1
        L = x.shape[-1]
        xp = jnp.pad(x, ((0, 0), (0, 0), (1, 1)))
        taps = jnp.stack([xp[:, :, k:k + L] for k in range(3)], axis=-1)
        return jnp.einsum('bclk,ock->bol', taps, w, precision=hi) \
            + b[None, :, None]

    def branch(x, w1, b1, w2, b2):
        h = jax.nn.relu(conv1d(x[:, None, :], w1, b1))
        h = jax.nn.relu(conv1d(h, w2, b2))
        B, C, L = h.shape
        hp = jnp.max(h.reshape(B, C, L // 2, 2), axis=-1)   # MaxPool1d(2,2)
        return jnp.mean(hp, axis=-1)                        # AdaptiveAvgPool1d(1)

    f1 = branch(ch1.astype(jnp.float32), p['conv1_1_w'], p['conv1_1_b'],
                p['conv1_2_w'], p['conv1_2_b'])
    f2 = branch(ch2.astype(jnp.float32), p['conv2_1_w'], p['conv2_1_b'],
                p['conv2_2_w'], p['conv2_2_b'])
    f4 = branch(ch4.astype(jnp.float32), p['conv4_1_w'], p['conv4_1_b'],
                p['conv4_2_w'], p['conv4_2_b'])
    f3 = jax.nn.relu(ch3.astype(jnp.float32).reshape(-1, 1)
                     @ p['fc_ch3_w'].T + p['fc_ch3_b'])
    comb = jnp.concatenate([f1, f2, f3, f4], axis=1)
    h = jax.nn.relu(jnp.dot(comb, p['fc1_w'].T, precision=hi) + p['fc1_b'])
    h = jax.nn.relu(jnp.dot(h, p['fc2_w'].T, precision=hi) + p['fc2_b'])
    return (jnp.dot(h, p['fc3_w'].T, precision=hi) + p['fc3_b'])[:, 0]


if __name__ == "__main__":
    B, L = 2, 16
    key = jax.random.PRNGKey(0)
    k1, k2, k3, k4, kp = jax.random.split(key, 5)

    channel1 = jax.random.normal(k1, (B, L), dtype=jnp.float32)
    channel2 = jax.random.normal(k2, (B, L), dtype=jnp.float32)
    channel3 = jax.random.normal(k3, (B,), dtype=jnp.float32)   # scalar feature
    channel4 = jax.random.normal(k4, (B, L), dtype=jnp.float32)

    params = init_params(kp)

    out = jax.block_until_ready(
        net_forward(channel1, channel2, channel3, channel4, params))
    ref = jax.block_until_ready(
        net_reference(channel1, channel2, channel3, channel4, params))

    assert out.shape == (B,)
    assert bool(jnp.all(jnp.isfinite(out)))
    max_err = float(jnp.max(jnp.abs(out - ref)))
    assert max_err < 2e-3, f"kernel/reference mismatch: {max_err}"
    print("KERNEL_OK")
</pallas_src>

<mosaic_0001>
module attributes {stable_mosaic.version = 11 : i64} {
  func.func @net_kernel(%arg0: i32, %arg1: memref<32x3xf32, #tpu.memory_space<vmem>>, %arg2: memref<2x1xf32, #tpu.memory_space<vmem>>, %arg3: memref<3x3x96xf32, #tpu.memory_space<vmem>>, %arg4: memref<1x96xf32, #tpu.memory_space<vmem>>, %arg5: memref<3x96x192xf32, #tpu.memory_space<vmem>>, %arg6: memref<1x192xf32, #tpu.memory_space<vmem>>, %arg7: memref<1x32xf32, #tpu.memory_space<vmem>>, %arg8: memref<1x32xf32, #tpu.memory_space<vmem>>, %arg9: memref<224x120xf32, #tpu.memory_space<vmem>>, %arg10: memref<1x120xf32, #tpu.memory_space<vmem>>, %arg11: memref<120x84xf32, #tpu.memory_space<vmem>>, %arg12: memref<1x84xf32, #tpu.memory_space<vmem>>, %arg13: memref<1x84xf32, #tpu.memory_space<vmem>>, %arg14: memref<1x1xf32, #tpu.memory_space<vmem>>, %arg15: memref<1x2xf32, #tpu.memory_space<vmem>>) attributes {dimension_semantics = [#tpu.dimension_semantics<parallel>], iteration_bounds = array<i64: 1>, scalar_prefetch = 0 : i64, scratch_operands = 0 : i64, tpu.core_type = #tpu.core_type<tc>, window_params = [{transform_indices = @transform_0, window_bounds = array<i64: 32, 3>}, {transform_indices = @transform_1, window_bounds = array<i64: 2, 1>}, {pipeline_mode = #tpu.pipeline_mode<synchronous>, transform_indices = @transform_2, window_bounds = array<i64: 3, 3, 96>}, {pipeline_mode = #tpu.pipeline_mode<synchronous>, transform_indices = @transform_3, window_bounds = array<i64: 1, 96>}, {pipeline_mode = #tpu.pipeline_mode<synchronous>, transform_indices = @transform_4, window_bounds = array<i64: 3, 96, 192>}, {pipeline_mode = #tpu.pipeline_mode<synchronous>, transform_indices = @transform_5, window_bounds = array<i64: 1, 192>}, {pipeline_mode = #tpu.pipeline_mode<synchronous>, transform_indices = @transform_6, window_bounds = array<i64: 1, 32>}, {pipeline_mode = #tpu.pipeline_mode<synchronous>, transform_indices = @transform_7, window_bounds = array<i64: 1, 32>}, {pipeline_mode = #tpu.pipeline_mode<synchronous>, transform_indices = @transform_8, window_bounds = array<i64: 224, 120>}, {pipeline_mode = #tpu.pipeline_mode<synchronous>, transform_indices = @transform_9, window_bounds = array<i64: 1, 120>}, {pipeline_mode = #tpu.pipeline_mode<synchronous>, transform_indices = @transform_10, window_bounds = array<i64: 120, 84>}, {pipeline_mode = #tpu.pipeline_mode<synchronous>, transform_indices = @transform_11, window_bounds = array<i64: 1, 84>}, {pipeline_mode = #tpu.pipeline_mode<synchronous>, transform_indices = @transform_12, window_bounds = array<i64: 1, 84>}, {pipeline_mode = #tpu.pipeline_mode<synchronous>, transform_indices = @transform_13, window_bounds = array<i64: 1, 1>}, {transform_indices = @transform_14, window_bounds = array<i64: 1, 2>}]} {
    %0 = tpu.iota {dimensions = array<i32: 0>} : vector<32x1xi32>
    %c16_i32 = arith.constant 16 : i32
    %c0_i32 = arith.constant 0 : i32
    %1 = arith.cmpi eq, %c16_i32, %c0_i32 : i32
    %c1_i32 = arith.constant 1 : i32
    %2 = arith.select %1, %c1_i32, %c16_i32 : i32
    %3 = vector.broadcast %2 : i32 to vector<32x1xi32>
    %4 = arith.remsi %0, %3 : vector<32x1xi32>
    %c0_i32_0 = arith.constant 0 : i32
    %5 = vector.broadcast %c0_i32_0 : i32 to vector<32x1xi32>
    %6 = arith.cmpi ne, %4, %5 : vector<32x1xi32>
    %c0_i32_1 = arith.constant 0 : i32
    %7 = vector.broadcast %c0_i32_1 : i32 to vector<32x1xi32>
    %8 = arith.cmpi slt, %4, %7 : vector<32x1xi32>
    %c0_i32_2 = arith.constant 0 : i32
    %9 = arith.cmpi slt, %2, %c0_i32_2 : i32
    %10 = vector.broadcast %9 : i1 to vector<32x1xi1>
    %11 = vector.broadcast %10 : vector<32x1xi1> to vector<32x1xi1>
    %12 = arith.xori %8, %11 : vector<32x1xi1>
    %13 = arith.andi %12, %6 : vector<32x1xi1>
    %14 = vector.broadcast %2 : i32 to vector<32x1xi32>
    %15 = arith.addi %4, %14 : vector<32x1xi32>
    %16 = arith.select %13, %15, %4 : vector<32x1xi1>, vector<32x1xi32>
    %c0_i32_3 = arith.constant 0 : i32
    %17 = vector.broadcast %c0_i32_3 : i32 to vector<32x1xi32>
    %18 = arith.cmpi eq, %16, %17 : vector<32x1xi32>
    %c15_i32 = arith.constant 15 : i32
    %19 = vector.broadcast %c15_i32 : i32 to vector<32x1xi32>
    %20 = arith.cmpi eq, %16, %19 : vector<32x1xi32>
    %c1_i32_4 = arith.constant 1 : i32
    %21 = vector.broadcast %c1_i32_4 : i32 to vector<32x1xi32>
    %22 = arith.andi %16, %21 : vector<32x1xi32>
    %c0_i32_5 = arith.constant 0 : i32
    %23 = vector.broadcast %c0_i32_5 : i32 to vector<32x1xi32>
    %24 = arith.cmpi eq, %22, %23 : vector<32x1xi32>
    %c0 = arith.constant 0 : index
    %c0_6 = arith.constant 0 : index
    %25 = vector.load %arg1[%c0, %c0_6] : memref<32x3xf32, #tpu.memory_space<vmem>>, vector<32x3xf32>
    %c1_i32_7 = arith.constant 1 : i32
    %26 = tpu.dynamic_rotate %25 by %c1_i32_7 dim 0 : vector<32x3xf32>, i32 -> vector<32x3xf32>
    %cst = arith.constant 0.000000e+00 : f32
    %27 = vector.shape_cast %18 : vector<32x1xi1> to vector<32x1xi1>
    %28 = vector.broadcast %27 : vector<32x1xi1> to vector<32x3xi1>
    %29 = vector.broadcast %cst : f32 to vector<32x3xf32>
    %30 = arith.select %28, %29, %26 : vector<32x3xi1>, vector<32x3xf32>
    %c31_i32 = arith.constant 31 : i32
    %31 = tpu.dynamic_rotate %25 by %c31_i32 dim 0 : vector<32x3xf32>, i32 -> vector<32x3xf32>
    %cst_8 = arith.constant 0.000000e+00 : f32
    %32 = vector.shape_cast %20 : vector<32x1xi1> to vector<32x1xi1>
    %33 = vector.broadcast %32 : vector<32x1xi1> to vector<32x3xi1>
    %34 = vector.broadcast %cst_8 : f32 to vector<32x3xf32>
    %35 = arith.select %33, %34, %31 : vector<32x3xi1>, vector<32x3xf32>
    %c0_9 = arith.constant 0 : index
    %c0_10 = arith.constant 0 : index
    %c0_11 = arith.constant 0 : index
    %36 = vector.load %arg3[%c0_9, %c0_10, %c0_11] : memref<3x3x96xf32, #tpu.memory_space<vmem>>, vector<1x3x96xf32>
    %37 = vector.shape_cast %36 : vector<1x3x96xf32> to vector<3x96xf32>
    %cst_12 = arith.constant dense<0.000000e+00> : vector<32x96xf32>
    %38 = tpu.matmul %30, %37, %cst_12 {dimension_numbers = #tpu.dot_dimension_numbers<[1], [0], [0], [1], [0, 0, 1, 1], [], []>} : vector<32x3xf32>, vector<3x96xf32>, vector<32x96xf32> -> vector<32x96xf32>
    %c1 = arith.constant 1 : index
    %c0_13 = arith.constant 0 : index
    %c0_14 = arith.constant 0 : index
    %39 = vector.load %arg3[%c1, %c0_13, %c0_14] : memref<3x3x96xf32, #tpu.memory_space<vmem>>, vector<1x3x96xf32>
    %40 = vector.shape_cast %39 : vector<1x3x96xf32> to vector<3x96xf32>
    %cst_15 = arith.constant dense<0.000000e+00> : vector<32x96xf32>
    %41 = tpu.matmul %25, %40, %cst_15 {dimension_numbers = #tpu.dot_dimension_numbers<[1], [0], [0], [1], [0, 0, 1, 1], [], []>} : vector<32x3xf32>, vector<3x96xf32>, vector<32x96xf32> -> vector<32x96xf32>
    %42 = arith.addf %38, %41 : vector<32x96xf32>
    %c2 = arith.constant 2 : index
    %c0_16 = arith.constant 0 : index
    %c0_17 = arith.constant 0 : index
    %43 = vector.load %arg3[%c2, %c0_16, %c0_17] : memref<3x3x96xf32, #tpu.memory_space<vmem>>, vector<1x3x96xf32>
    %44 = vector.shape_cast %43 : vector<1x3x96xf32> to vector<3x96xf32>
    %cst_18 = arith.constant dense<0.000000e+00> : vector<32x96xf32>
    %45 = tpu.matmul %35, %44, %cst_18 {dimension_numbers = #tpu.dot_dimension_numbers<[1], [0], [0], [1], [0, 0, 1, 1], [], []>} : vector<32x3xf32>, vector<3x96xf32>, vector<32x96xf32> -> vector<32x96xf32>
    %46 = arith.addf %42, %45 : vector<32x96xf32>
    %c0_19 = arith.constant 0 : index
    %c0_20 = arith.constant 0 : index
    %47 = vector.load %arg4[%c0_19, %c0_20] : memref<1x96xf32, #tpu.memory_space<vmem>>, vector<1x96xf32>
    %48 = vector.broadcast %47 : vector<1x96xf32> to vector<32x96xf32>
    %49 = arith.addf %46, %48 : vector<32x96xf32>
    %cst_21 = arith.constant 0.000000e+00 : f32
    %50 = vector.broadcast %cst_21 : f32 to vector<32x96xf32>
    %51 = arith.maximumf %49, %50 : vector<32x96xf32>
    %c1_i32_22 = arith.constant 1 : i32
    %52 = tpu.dynamic_rotate %51 by %c1_i32_22 dim 0 : vector<32x96xf32>, i32 -> vector<32x96xf32>
    %cst_23 = arith.constant 0.000000e+00 : f32
    %53 = vector.shape_cast %18 : vector<32x1xi1> to vector<32x1xi1>
    %54 = vector.broadcast %53 : vector<32x1xi1> to vector<32x96xi1>
    %55 = vector.broadcast %cst_23 : f32 to vector<32x96xf32>
    %56 = arith.select %54, %55, %52 : vector<32x96xi1>, vector<32x96xf32>
    %c31_i32_24 = arith.constant 31 : i32
    %57 = tpu.dynamic_rotate %51 by %c31_i32_24 dim 0 : vector<32x96xf32>, i32 -> vector<32x96xf32>
    %cst_25 = arith.constant 0.000000e+00 : f32
    %58 = vector.shape_cast %20 : vector<32x1xi1> to vector<32x1xi1>
    %59 = vector.broadcast %58 : vector<32x1xi1> to vector<32x96xi1>
    %60 = vector.broadcast %cst_25 : f32 to vector<32x96xf32>
    %61 = arith.select %59, %60, %57 : vector<32x96xi1>, vector<32x96xf32>
    %c0_26 = arith.constant 0 : index
    %c0_27 = arith.constant 0 : index
    %c0_28 = arith.constant 0 : index
    %62 = vector.load %arg5[%c0_26, %c0_27, %c0_28] : memref<3x96x192xf32, #tpu.memory_space<vmem>>, vector<1x96x192xf32>
    %63 = vector.shape_cast %62 : vector<1x96x192xf32> to vector<96x192xf32>
    %cst_29 = arith.constant dense<0.000000e+00> : vector<32x192xf32>
    %64 = tpu.matmul %56, %63, %cst_29 {dimension_numbers = #tpu.dot_dimension_numbers<[1], [0], [0], [1], [0, 0, 1, 1], [], []>} : vector<32x96xf32>, vector<96x192xf32>, vector<32x192xf32> -> vector<32x192xf32>
    %c1_30 = arith.constant 1 : index
    %c0_31 = arith.constant 0 : index
    %c0_32 = arith.constant 0 : index
    %65 = vector.load %arg5[%c1_30, %c0_31, %c0_32] : memref<3x96x192xf32, #tpu.memory_space<vmem>>, vector<1x96x192xf32>
    %66 = vector.shape_cast %65 : vector<1x96x192xf32> to vector<96x192xf32>
    %cst_33 = arith.constant dense<0.000000e+00> : vector<32x192xf32>
    %67 = tpu.matmul %51, %66, %cst_33 {dimension_numbers = #tpu.dot_dimension_numbers<[1], [0], [0], [1], [0, 0, 1, 1], [], []>} : vector<32x96xf32>, vector<96x192xf32>, vector<32x192xf32> -> vector<32x192xf32>
    %68 = arith.addf %64, %67 : vector<32x192xf32>
    %c2_34 = arith.constant 2 : index
    %c0_35 = arith.constant 0 : index
    %c0_36 = arith.constant 0 : index
    %69 = vector.load %arg5[%c2_34, %c0_35, %c0_36] : memref<3x96x192xf32, #tpu.memory_space<vmem>>, vector<1x96x192xf32>
    %70 = vector.shape_cast %69 : vector<1x96x192xf32> to vector<96x192xf32>
    %cst_37 = arith.constant dense<0.000000e+00> : vector<32x192xf32>
    %71 = tpu.matmul %61, %70, %cst_37 {dimension_numbers = #tpu.dot_dimension_numbers<[1], [0], [0], [1], [0, 0, 1, 1], [], []>} : vector<32x96xf32>, vector<96x192xf32>, vector<32x192xf32> -> vector<32x192xf32>
    %72 = arith.addf %68, %71 : vector<32x192xf32>
    %c0_38 = arith.constant 0 : index
    %c0_39 = arith.constant 0 : index
    %73 = vector.load %arg6[%c0_38, %c0_39] : memref<1x192xf32, #tpu.memory_space<vmem>>, vector<1x192xf32>
    %74 = vector.broadcast %73 : vector<1x192xf32> to vector<32x192xf32>
    %75 = arith.addf %72, %74 : vector<32x192xf32>
    %cst_40 = arith.constant 0.000000e+00 : f32
    %76 = vector.broadcast %cst_40 : f32 to vector<32x192xf32>
    %77 = arith.maximumf %75, %76 : vector<32x192xf32>
    %c31_i32_41 = arith.constant 31 : i32
    %78 = tpu.dynamic_rotate %77 by %c31_i32_41 dim 0 : vector<32x192xf32>, i32 -> vector<32x192xf32>
    %79 = arith.subf %77, %78 : vector<32x192xf32>
    %80 = math.absf %79 : vector<32x192xf32>
    %cst_42 = arith.constant 0.000000e+00 : f32
    %81 = vector.shape_cast %24 : vector<32x1xi1> to vector<32x1xi1>
    %82 = vector.broadcast %81 : vector<32x1xi1> to vector<32x192xi1>
    %83 = vector.broadcast %cst_42 : f32 to vector<32x192xf32>
    %84 = arith.select %82, %80, %83 : vector<32x192xi1>, vector<32x192xf32>
    %85 = arith.addf %77, %84 : vector<32x192xf32>
    %86 = vector.shape_cast %85 : vector<32x192xf32> to vector<2x16x192xf32>
    %cst_43 = arith.constant dense<0.000000e+00> : vector<2x192xf32>
    %87 = vector.multi_reduction <add>, %86, %cst_43 [1] : vector<2x16x192xf32> to vector<2x192xf32>
    %cst_44 = arith.constant 6.250000e-02 : f32
    %88 = vector.broadcast %cst_44 : f32 to vector<2x192xf32>
    %89 = arith.mulf %87, %88 : vector<2x192xf32>
    %c0_45 = arith.constant 0 : index
    %c0_46 = arith.constant 0 : index
    %90 = vector.load %arg2[%c0_45, %c0_46] : memref<2x1xf32, #tpu.memory_space<vmem>>, vector<2x1xf32>
    %c0_47 = arith.constant 0 : index
    %c0_48 = arith.constant 0 : index
    %91 = vector.load %arg7[%c0_47, %c0_48] : memref<1x32xf32, #tpu.memory_space<vmem>>, vector<1x32xf32>
    %92 = vector.broadcast %90 : vector<2x1xf32> to vector<2x32xf32>
    %93 = vector.broadcast %91 : vector<1x32xf32> to vector<2x32xf32>
    %94 = arith.mulf %92, %93 : vector<2x32xf32>
    %c0_49 = arith.constant 0 : index
    %c0_50 = arith.constant 0 : index
    %95 = vector.load %arg8[%c0_49, %c0_50] : memref<1x32xf32, #tpu.memory_space<vmem>>, vector<1x32xf32>
    %96 = vector.broadcast %95 : vector<1x32xf32> to vector<2x32xf32>
    %97 = arith.addf %94, %96 : vector<2x32xf32>
    %cst_51 = arith.constant 0.000000e+00 : f32
    %98 = vector.broadcast %cst_51 : f32 to vector<2x32xf32>
    %99 = arith.maximumf %97, %98 : vector<2x32xf32>
    %100 = tpu.concatenate %89, %99 in 1 : vector<2x192xf32>, vector<2x32xf32> -> vector<2x224xf32>
    %c0_52 = arith.constant 0 : index
    %c0_53 = arith.constant 0 : index
    %101 = vector.load %arg9[%c0_52, %c0_53] : memref<224x120xf32, #tpu.memory_space<vmem>>, vector<224x120xf32>
    %cst_54 = arith.constant dense<0.000000e+00> : vector<2x120xf32>
    %102 = tpu.matmul %100, %101, %cst_54 {dimension_numbers = #tpu.dot_dimension_numbers<[1], [0], [0], [1], [0, 0, 1, 1], [], []>} : vector<2x224xf32>, vector<224x120xf32>, vector<2x120xf32> -> vector<2x120xf32>
    %c0_55 = arith.constant 0 : index
    %c0_56 = arith.constant 0 : index
    %103 = vector.load %arg10[%c0_55, %c0_56] : memref<1x120xf32, #tpu.memory_space<vmem>>, vector<1x120xf32>
    %104 = vector.broadcast %103 : vector<1x120xf32> to vector<2x120xf32>
    %105 = arith.addf %102, %104 : vector<2x120xf32>
    %cst_57 = arith.constant 0.000000e+00 : f32
    %106 = vector.broadcast %cst_57 : f32 to vector<2x120xf32>
    %107 = arith.maximumf %105, %106 : vector<2x120xf32>
    %c0_58 = arith.constant 0 : index
    %c0_59 = arith.constant 0 : index
    %108 = vector.load %arg11[%c0_58, %c0_59] : memref<120x84xf32, #tpu.memory_space<vmem>>, vector<120x84xf32>
    %cst_60 = arith.constant dense<0.000000e+00> : vector<2x84xf32>
    %109 = tpu.matmul %107, %108, %cst_60 {dimension_numbers = #tpu.dot_dimension_numbers<[1], [0], [0], [1], [0, 0, 1, 1], [], []>} : vector<2x120xf32>, vector<120x84xf32>, vector<2x84xf32> -> vector<2x84xf32>
    %c0_61 = arith.constant 0 : index
    %c0_62 = arith.constant 0 : index
    %110 = vector.load %arg12[%c0_61, %c0_62] : memref<1x84xf32, #tpu.memory_space<vmem>>, vector<1x84xf32>
    %111 = vector.broadcast %110 : vector<1x84xf32> to vector<2x84xf32>
    %112 = arith.addf %109, %111 : vector<2x84xf32>
    %cst_63 = arith.constant 0.000000e+00 : f32
    %113 = vector.broadcast %cst_63 : f32 to vector<2x84xf32>
    %114 = arith.maximumf %112, %113 : vector<2x84xf32>
    %c0_64 = arith.constant 0 : index
    %c0_65 = arith.constant 0 : index
    %115 = vector.load %arg13[%c0_64, %c0_65] : memref<1x84xf32, #tpu.memory_space<vmem>>, vector<1x84xf32>
    "tpu.trace_start"() <{level = 10 : i32, message = "oj,bj->ob"}> : () -> ()
    %cst_66 = arith.constant dense<0.000000e+00> : vector<1x2xf32>
    %116 = tpu.matmul %115, %114, %cst_66 {dimension_numbers = #tpu.dot_dimension_numbers<[1], [1], [0], [0], [0, 0, 1, 0], [], []>} : vector<1x84xf32>, vector<2x84xf32>, vector<1x2xf32> -> vector<1x2xf32>
    "tpu.trace_stop"() : () -> ()
    %c0_67 = arith.constant 0 : index
    %c0_68 = arith.constant 0 : index
    %117 = vector.load %arg14[%c0_67, %c0_68] : memref<1x1xf32, #tpu.memory_space<vmem>>, vector<1x1xf32>
    %118 = vector.broadcast %117 : vector<1x1xf32> to vector<1x2xf32>
    %119 = arith.addf %116, %118 : vector<1x2xf32>
    %c0_69 = arith.constant 0 : index
    %c0_70 = arith.constant 0 : index
    %120 = vector.load %arg15[%c0_69, %c0_70] : memref<1x2xf32, #tpu.memory_space<vmem>>, vector<1x2xf32>
    tpu.vector_store %arg15[%c0_69, %c0_70], %119 {strides = array<i32>} : memref<1x2xf32, #tpu.memory_space<vmem>>, vector<1x2xf32>,
    return
  }
  func.func @transform_0(%arg0: i32) -> (i32, i32) {
    %c0_i32 = arith.constant 0 : i32
    %c0_i32_0 = arith.constant 0 : i32
    return %arg0, %c0_i32 : i32, i32
  }
  func.func @transform_1(%arg0: i32) -> (i32, i32) {
    %c0_i32 = arith.constant 0 : i32
    %c0_i32_0 = arith.constant 0 : i32
    return %arg0, %c0_i32 : i32, i32
  }
  func.func @transform_2(%arg0: i32) -> (i32, i32, i32) {
    %c0_i32 = arith.constant 0 : i32
    %c0_i32_0 = arith.constant 0 : i32
    %c0_i32_1 = arith.constant 0 : i32
    %c0_i32_2 = arith.constant 0 : i32
    return %c0_i32, %c0_i32_0, %c0_i32_1 : i32, i32, i32
  }
  func.func @transform_3(%arg0: i32) -> (i32, i32) {
    %c0_i32 = arith.constant 0 : i32
    %c0_i32_0 = arith.constant 0 : i32
    %c0_i32_1 = arith.constant 0 : i32
    return %c0_i32, %c0_i32_0 : i32, i32
  }
  func.func @transform_4(%arg0: i32) -> (i32, i32, i32) {
    %c0_i32 = arith.constant 0 : i32
    %c0_i32_0 = arith.constant 0 : i32
    %c0_i32_1 = arith.constant 0 : i32
    %c0_i32_2 = arith.constant 0 : i32
    return %c0_i32, %c0_i32_0, %c0_i32_1 : i32, i32, i32
  }
  func.func @transform_5(%arg0: i32) -> (i32, i32) {
    %c0_i32 = arith.constant 0 : i32
    %c0_i32_0 = arith.constant 0 : i32
    %c0_i32_1 = arith.constant 0 : i32
    return %c0_i32, %c0_i32_0 : i32, i32
  }
  func.func @transform_6(%arg0: i32) -> (i32, i32) {
    %c0_i32 = arith.constant 0 : i32
    %c0_i32_0 = arith.constant 0 : i32
    %c0_i32_1 = arith.constant 0 : i32
    return %c0_i32, %c0_i32_0 : i32, i32
  }
  func.func @transform_7(%arg0: i32) -> (i32, i32) {
    %c0_i32 = arith.constant 0 : i32
    %c0_i32_0 = arith.constant 0 : i32
    %c0_i32_1 = arith.constant 0 : i32
    return %c0_i32, %c0_i32_0 : i32, i32
  }
  func.func @transform_8(%arg0: i32) -> (i32, i32) {
    %c0_i32 = arith.constant 0 : i32
    %c0_i32_0 = arith.constant 0 : i32
    %c0_i32_1 = arith.constant 0 : i32
    return %c0_i32, %c0_i32_0 : i32, i32
  }
  func.func @transform_9(%arg0: i32) -> (i32, i32) {
    %c0_i32 = arith.constant 0 : i32
    %c0_i32_0 = arith.constant 0 : i32
    %c0_i32_1 = arith.constant 0 : i32
    return %c0_i32, %c0_i32_0 : i32, i32
  }
  func.func @transform_10(%arg0: i32) -> (i32, i32) {
    %c0_i32 = arith.constant 0 : i32
    %c0_i32_0 = arith.constant 0 : i32
    %c0_i32_1 = arith.constant 0 : i32
    return %c0_i32, %c0_i32_0 : i32, i32
  }
  func.func @transform_11(%arg0: i32) -> (i32, i32) {
    %c0_i32 = arith.constant 0 : i32
    %c0_i32_0 = arith.constant 0 : i32
    %c0_i32_1 = arith.constant 0 : i32
    return %c0_i32, %c0_i32_0 : i32, i32
  }
  func.func @transform_12(%arg0: i32) -> (i32, i32) {
    %c0_i32 = arith.constant 0 : i32
    %c0_i32_0 = arith.constant 0 : i32
    %c0_i32_1 = arith.constant 0 : i32
    return %c0_i32, %c0_i32_0 : i32, i32
  }
  func.func @transform_13(%arg0: i32) -> (i32, i32) {
    %c0_i32 = arith.constant 0 : i32
    %c0_i32_0 = arith.constant 0 : i32
    %c0_i32_1 = arith.constant 0 : i32
    return %c0_i32, %c0_i32_0 : i32, i32
  }
  func.func @transform_14(%arg0: i32) -> (i32, i32) {
    %c0_i32 = arith.constant 0 : i32
    %c0_i32_0 = arith.constant 0 : i32
    return %c0_i32, %arg0 : i32, i32
  }
}

</mosaic_0001>

<bundles_post_ra>
// kernel: tpu_custom_call.1
= control target key start
LH: loop header
LB: loop body
LE: loop exit
PB: predicated region body
PF: predicated region fallthrough
CT: control target
= control target key end

     0   :  { %s1601_s0 = inlined_call_operand.vmem [shape: f32[32,3], index: 0, kind: input, shape index: {}]   ;;  %s1602_s1 = inlined_call_operand.vmem [shape: f32[2,1], index: 1, kind: input, shape index: {}]   ;;  %s1603_s2 = inlined_call_operand.vmem [shape: f32[3,3,96], index: 2, kind: input, shape index: {}]   ;;  %s1604_s3 = inlined_call_operand.vmem [shape: f32[1,96], index: 3, kind: input, shape index: {}]   ;;  %s1605_s4 = inlined_call_operand.hbm [shape: f32[3,96,192], index: 4, kind: input, shape index: {}]   ;;  %s1606_s5 = inlined_call_operand.vmem [shape: f32[1,192], index: 5, kind: input, shape index: {}]   ;;  %s1607_s6 = inlined_call_operand.vmem [shape: f32[1,32], index: 6, kind: input, shape index: {}]   ;;  %s1608_s7 = inlined_call_operand.vmem [shape: f32[1,32], index: 7, kind: input, shape index: {}]   ;;  %s1609_s8 = inlined_call_operand.vmem [shape: f32[224,120], index: 8, kind: input, shape index: {}]   ;;  %s1610_s9 = inlined_call_operand.vmem [shape: f32[1,120], index: 9, kind: input, shape index: {}]   ;;  %s1611_s10 = inlined_call_operand.vmem [shape: f32[120,84], index: 10, kind: input, shape index: {}]   ;;  %s1612_s11 = inlined_call_operand.vmem [shape: f32[1,84], index: 11, kind: input, shape index: {}]   ;;  %s1613_s12 = inlined_call_operand.vmem [shape: f32[1,84], index: 12, kind: input, shape index: {}]   ;;  %s1614_s13 = inlined_call_operand.<no memory space> [shape: f32[1,1], index: 13, kind: input, shape index: {}]   ;;  %s1615_s14 = inlined_call_operand.hbm [shape: f32[1,2], index: 14, kind: output, shape index: {}]  }
   0x1   :  { %v19_v0 = vstv %s1614_s13 }
   0x2   :  { %20 = vst [vmem:[#allocation2] sm:$0x1] %v19_v0 }
   0x3   :  { %21 = vsyncpa [#allocation4], 0 }
   0x4   :  { %22 = vsyncpa [#allocation5], 0  ;;  %s35_s17 = sshll.u32 %s1605_s4, 4  ;;  %s1084_s18 = smov [#allocation3]   ;;  %s36_s17 = int_to_ptr.hbm [resolvable:$true] %s35_s17 }
   0x5   :  { %s37_s19 = sshll.u32 %s1084_s18, 4  ;;  %s1085_s20 = smov 256   ;;  %s38_s19 = int_to_ptr.vmem [resolvable:$true] %s37_s19 }
   0x6   :  { %s1086_s21 = smov 16  }
   0x7   :  { %43 = dma.hbm_to_vmem [thread:$0]  %s36_s17, 9216, %s38_s19, [#allocation4], %s1085_s20, %s1085_s20, %s1086_s21  }
   0x8   :  { %1080 = dma.done.wait [#allocation4], 9216  }
   0x9   :  { %1081 = vsyncadd [#allocation4], 4294958080  ;;  %v66_v1 = vlaneseq  ;;  %vm197_vm0 = vcmask 1042432   ;;  %vm184_vm1 = vcmask 23552   ;;  %v973_v4 = vld [vmem:[%s1603_s2 + $0x4] sm:$0x7] }
   0xa   :  { %v1180_v5 = vld [vmem:[%s1601_s0 + $0x18] sm:$0xff]  ;;  %v181_v6 = vld [vmem:[%s1603_s2] sm:$0x7]  ;;  %1018 = vmatpush.msk.msra.mxu2 %vm197_vm0, %v973_v4  ;;  %v984_v9 = vld [vmem:[%s1603_s2 + $0x8] sm:$0x7]  ;;  %974 = vmatpush.msk.msra.mxu0 %vm197_vm0, %v973_v4  ;;  %v1087_v50 = vmov 0  }
   0xb   :  { %v1171_v2 = vshrl.u32 %v66_v1, 7  ;;  %v142_v7 = vrot.slane %v1180_v5, 7  ;;  %979 = vmatpush.msk.msra.mxu1 %vm197_vm0, %v181_v6  ;;  %v135_v8 = vld [vmem:[%s1601_s0] sm:$0xff]  ;;  %978 = vmatmul.msk.f32.vlgmr.msra.gmra.mxu2 %vm184_vm1, %v1180_v5  ;;  %v136_v12 = vld [vmem:[%s1601_s0 + $0x8] sm:$0xff]  ;;  %v407_v15 = vld [vmem:[#allocation3 + $0x170] sm:$0xff]  ;;  %v163_v38 = vrot.slane %v1180_v5, 1 }
   0xc   :  { %v139_v11 = vrot.slane %v135_v8, 7  ;;  %985 = vmatpush.msk.msrb.mxu2 %vm197_vm0, %v984_v9  ;;  %v160_v13 = vrot.slane %v135_v8, 1  ;;  %v161_v14 = vrot.slane %v136_v12, 1  ;;  %975 = vmatmul.msk.f32.vlgmr.msra.gmra.mxu0 %vm184_vm1, %v135_v8  ;;  %v408_v16 = vld [vmem:[#allocation3 + $0x178] sm:$0xff]  ;;  %v137_v19 = vld [vmem:[%s1601_s0 + $0x10] sm:$0xff]  ;;  %v405_v20 = vld [vmem:[#allocation3 + $0x160] sm:$0xff] }
   0xd   :  { %v75_v3 = vand.u32 15, %v1171_v2  ;;  %vm143_vm2 = vcmp.lt.s32.totalorder %v1171_v2, 1  ;;  %vm164_vm4 = vcmp.lt.s32.totalorder %v1171_v2, 7  ;;  %v1213_v18 = vadd.s32 8, %v1171_v2  ;;  %426 = vmatpush.msra.mxu3 %v407_v15  ;;  %455 = vmatpush.msrb.mxu0 %v408_v16  ;;  %v406_v21 = vld [vmem:[#allocation3 + $0x168] sm:$0xff]  ;;  %v403_v23 = vld [vmem:[#allocation3 + $0x150] sm:$0xff] }
   0xe   :  { %v147_v17 = vsel %vm143_vm2, %v142_v7, %v139_v11  ;;  %v404_v24 = vld [vmem:[#allocation3 + $0x158] sm:$0xff]  ;;  %v167_v25 = vsel %vm164_vm4, %v160_v13, %v161_v14  ;;  %v140_v26 = vrot.slane %v136_v12, 7  ;;  %v162_v28 = vrot.slane %v137_v19, 1  ;;  %v401_v47 = vld [vmem:[#allocation3 + $0x140] sm:$0xff]  ;;  %v402_v48 = vld [vmem:[#allocation3 + $0x148] sm:$0xff]  ;;  %1025 = vset.pattern.permute.xlu0 %v1087_v50  ;;  %1026 = vset.pattern.permute.xlu1 %v1087_v50  ;;  %s1088_s13 = smov 64  }
   0xf   :  { %vm1199_vm3 = vcmp.eq.s32.totalorder %v75_v3, 0  ;;  %427 = vmatpush.msra.mxu3 %v405_v20  ;;  %456 = vmatpush.msrb.mxu0 %v406_v21  ;;  %v82_v27 = vand.u32 15, %v1213_v18  ;;  %v1225_v29 = vadd.s32 16, %v1171_v2  ;;  %v141_v34 = vrot.slane %v137_v19, 7  ;;  %v768_v49 = vld [vmem:[%s1602_s1] sm:$0x3] }
  0x10   :  { %v156_v22 = vsel %vm1199_vm3, 0.0, %v147_v17  ;;  %v146_v30 = vsel %vm143_vm2, %v139_v11, %v140_v26  ;;  %v166_v32 = vsel %vm164_vm4, %v161_v14, %v162_v28  ;;  %v1257_v40 = vadd.s32 24, %v1171_v2  ;;  %772 = vperm.xlu0 %1025, %v768_v49   ;;  %v399_v51 = vld [vmem:[#allocation3 + $0x130] sm:$0xff]  ;;  %v400_v52 = vld [vmem:[#allocation3 + $0x138] sm:$0xff]  ;;  %v397_v53 = vld [vmem:[#allocation3 + $0x120] sm:$0xff]  ;;  %s1089_s16 = smov [#allocation6]  }
  0x11   :  { %980 = vmatmul.msk.f32.vlgmr.msra.gmra.mxu1 %vm184_vm1, %v156_v22  ;;  %428 = vmatpush.msra.mxu3 %v403_v23  ;;  %vm1233_vm5 = vcmp.eq.s32.totalorder %v82_v27, 15  ;;  %v89_v33 = vand.u32 15, %v1225_v29  ;;  %v145_v37 = vsel %vm143_vm2, %v140_v26, %v141_v34  ;;  %v165_v41 = vsel %vm164_vm4, %v162_v28, %v163_v38  ;;  %v398_v54 = vld [vmem:[#allocation3 + $0x128] sm:$0xff]  ;;  %v395_v55 = vld [vmem:[#allocation3 + $0x110] sm:$0xff]  ;;  %v396_v56 = vld [vmem:[#allocation3 + $0x118] sm:$0xff]  ;;  %s961_s0 = sshll.u32 %s1089_s16, 4  ;;  %s962_s0 = int_to_ptr.vmem [resolvable:$true] %s961_s0 }
  0x12   :  { %457 = vmatpush.msrb.mxu0 %v404_v24  ;;  %v178_v35 = vsel %vm1233_vm5, 0.0, %v166_v32  ;;  %v96_v42 = vand.u32 15, %v1257_v40  ;;  %v144_v43 = vsel %vm143_vm2, %v141_v34, %v142_v7  ;;  %v168_v45 = vsel %vm164_vm4, %v163_v38, %v160_v13  ;;  %v393_v57 = vld [vmem:[#allocation3 + $0x100] sm:$0xff]  ;;  %v394_v58 = vld [vmem:[#allocation3 + $0x108] sm:$0xff]  ;;  %v391_v59 = vld [vmem:[#allocation3 + $0xf0] sm:$0xff]  ;;  %s963_s18 = sshll.u32 %s1615_s14, 4  ;;  %s964_s18 = int_to_ptr.hbm [resolvable:$true] %s963_s18 }
  0x13   :  { %986 = vmatmul.msk.f32.vlgmr.msrb.gmra.mxu2 %vm184_vm1, %v167_v25  ;;  %vm1245_vm6 = vcmp.eq.s32.totalorder %v89_v33, 0  ;;  %429 = vmatpush.msra.mxu3 %v401_v47  ;;  %v392_v60 = vld [vmem:[#allocation3 + $0xf8] sm:$0xff]  ;;  %v389_v61 = vld [vmem:[#allocation3 + $0xe0] sm:$0xff]  ;;  %v390_v62 = vld [vmem:[#allocation3 + $0xe8] sm:$0xff]  ;;  %vm409_vm8 = vcmask 785408   ;;  %vm738_vm11 = vcmask 523264  }
  0x14   :  { %976 = vmatmul.msk.f32.gmra.mxu0 %vm184_vm1, %v136_v12  ;;  %v158_v39 = vsel %vm1245_vm6, 0.0, %v145_v37  ;;  %vm1268_vm7 = vcmp.eq.s32.totalorder %v96_v42, 15  ;;  %v387_v63 = vld [vmem:[#allocation3 + $0xd0] sm:$0xff]  ;;  %v388_v0 = vld [vmem:[#allocation3 + $0xd8] sm:$0xff]  ;;  %v385_v1 = vld [vmem:[#allocation3 + $0xc0] sm:$0xff]  ;;  %vm789_vm14 = vcmask 1041409  }
  0x15   :  { %v180_v46 = vsel %vm1268_vm7, 0.0, %v168_v45  ;;  %458 = vmatpush.msrb.mxu0 %v402_v48  ;;  %430 = vmatpush.msra.mxu3 %v399_v51  ;;  %v386_v4 = vld [vmem:[#allocation3 + $0xc8] sm:$0xff]  ;;  %v383_v5 = vld [vmem:[#allocation3 + $0xb8] sm:$0xff]  ;;  %v382_v6 = vld [vmem:[#allocation3 + $0xb0] sm:$0xff]  ;;  %vm894_vm15 = vcmask 982016   ;;  %vm927_vm0 = vcmask 687104  }
  0x16   :  { %525 = vmatpush.msra.mxu2 %v383_v5  ;;  %v381_v7 = vld [vmem:[#allocation3 + $0xa8] sm:$0xff]  ;;  %496 = vmatpush.msrb.mxu1 %v382_v6  ;;  %v380_v8 = vld [vmem:[#allocation3 + $0xa0] sm:$0xff]  ;;  %v379_v9 = vld [vmem:[#allocation3 + $0x98] sm:$0xff] }
  0x17   :  { %459 = vmatpush.msrb.mxu0 %v400_v52  ;;  %431 = vmatpush.msra.mxu3 %v397_v53  ;;  %v378_v11 = vld [vmem:[#allocation3 + $0x90] sm:$0xff]  ;;  %v574_v13 = vld [vmem:[#allocation3 + $0x238] sm:$0xff]  ;;  %v377_v14 = vld [vmem:[#allocation3 + $0x88] sm:$0xff] }
  0x18   :  { %526 = vmatpush.msra.mxu2 %v381_v7  ;;  %497 = vmatpush.msrb.mxu1 %v380_v8  ;;  %v573_v12 = vld [vmem:[#allocation3 + $0x230] sm:$0xff]  ;;  %v376_v15 = vld [vmem:[#allocation3 + $0x80] sm:$0xff]  ;;  %v572_v17 = vld [vmem:[#allocation3 + $0x228] sm:$0xff] }
  0x19   :  { %981 = vmatmul.msk.f32.gmra.mxu1 %vm184_vm1, %v146_v30  ;;  %460 = vmatpush.msrb.mxu0 %v398_v54  ;;  %v571_v16 = vld [vmem:[#allocation3 + $0x220] sm:$0xff]  ;;  %v374_v20 = vld [vmem:[#allocation3 + $0x70] sm:$0xff]  ;;  %v570_v23 = vld [vmem:[#allocation3 + $0x218] sm:$0xff] }
  0x1a   :  { %432 = vmatpush.msra.mxu3 %v395_v55  ;;  %527 = vmatpush.msra.mxu2 %v379_v9  ;;  %v569_v21 = vld [vmem:[#allocation3 + $0x210] sm:$0xff]  ;;  %v372_v24 = vld [vmem:[#allocation3 + $0x60] sm:$0xff]  ;;  %v373_v25 = vld [vmem:[#allocation3 + $0x68] sm:$0xff] }
  0x1b   :  { %987 = vmatmul.msk.f32.gmra.mxu2 %vm184_vm1, %v178_v35  ;;  %461 = vmatpush.msrb.mxu0 %v396_v56  ;;  %v567_v28 = vld [vmem:[#allocation3 + $0x200] sm:$0xff]  ;;  %v568_v30 = vld [vmem:[#allocation3 + $0x208] sm:$0xff]  ;;  %v370_v34 = vld [vmem:[#allocation3 + $0x50] sm:$0xff] }
  0x1c   :  { %977 = vmatmul.msk.f32.gmra.mxu0 %vm184_vm1, %v137_v19  ;;  %433 = vmatpush.msra.mxu3 %v393_v57  ;;  %v375_v19 = vld [vmem:[#allocation3 + $0x78] sm:$0xff]  ;;  %v565_v37 = vld [vmem:[#allocation3 + $0x1f0] sm:$0xff]  ;;  %v564_v45 = vld [vmem:[#allocation3 + $0x1e8] sm:$0xff] }
  0x1d   :  { %462 = vmatpush.msrb.mxu0 %v394_v58  ;;  %498 = vmatpush.msrb.mxu1 %v378_v11  ;;  %v371_v35 = vld [vmem:[#allocation3 + $0x58] sm:$0xff]  ;;  %v561_v48 = vld [vmem:[#allocation3 + $0x1d0] sm:$0xff]  ;;  %v364_v51 = vld [vmem:[#allocation3 + $0x20] sm:$0xff] }
  0x1e   :  { %434 = vmatpush.msra.mxu3 %v391_v59  ;;  %528 = vmatpush.msra.mxu2 %v377_v14  ;;  %v566_v38 = vld [vmem:[#allocation3 + $0x1f8] sm:$0xff]  ;;  %v365_v52 = vld [vmem:[#allocation3 + $0x28] sm:$0xff]  ;;  %v559_v54 = vld [vmem:[#allocation3 + $0x1c0] sm:$0xff] }
  0x1f   :  { %463 = vmatpush.msrb.mxu0 %v392_v60  ;;  %499 = vmatpush.msrb.mxu1 %v376_v15  ;;  %v367_v47 = vld [vmem:[#allocation3 + $0x38] sm:$0xff]  ;;  %v560_v55 = vld [vmem:[#allocation3 + $0x1c8] sm:$0xff]  ;;  %v362_v57 = vld [vmem:[#allocation3 + $0x10] sm:$0xff] }
  0x20   :  { %435 = vmatpush.msra.mxu3 %v389_v61  ;;  %529 = vmatpush.msra.mxu2 %v375_v19  ;;  %v562_v50 = vld [vmem:[#allocation3 + $0x1d8] sm:$0xff]  ;;  %v557_v59 = vld [vmem:[#allocation3 + $0x1b0] sm:$0xff]  ;;  %v556_v5 = vld [vmem:[#allocation3 + $0x1a8] sm:$0xff] }
  0x21   :  { %982 = vmatmul.msk.f32.gmra.mxu1 %vm184_vm1, %v158_v39  ;;  %464 = vmatpush.msrb.mxu0 %v390_v62  ;;  %v368_v39 = vld [vmem:[#allocation3 + $0x40] sm:$0xff]  ;;  %v1027_v53 = vld [vmem:[%s1604_s3] ss:$0 sm:$0xff]  ;;  %v553_v7 = vld [vmem:[#allocation3 + $0x190] sm:$0xff] }
  0x22   :  { %436 = vmatpush.msra.mxu3 %v387_v63  ;;  %500 = vmatpush.msrb.mxu1 %v374_v20  ;;  %v363_v58 = vld [vmem:[#allocation3 + $0x18] sm:$0xff]  ;;  %v360_v63 = vld [vmem:[#allocation3] sm:$0xff] }
  0x23   :  { %988 = vmatmul.msk.f32.gmra.mxu2 %vm184_vm1, %v165_v41  ;;  %465 = vmatpush.msrb.mxu0 %v388_v0  ;;  %v369_v41 = vld [vmem:[#allocation3 + $0x48] sm:$0xff]  ;;  %v558_v62 = vld [vmem:[#allocation3 + $0x1b8] sm:$0xff] }
  0x24   :  { %437 = vmatpush.msra.mxu3 %v385_v1  ;;  %501 = vmatpush.msrb.mxu1 %v372_v24  ;;  %v361_v0 = vld [vmem:[#allocation3 + $0x8] sm:$0xff]  ;;  %v554_v8 = vld [vmem:[#allocation3 + $0x198] sm:$0xff] }
  0x25   :  { %466 = vmatpush.msrb.mxu0 %v386_v4  ;;  %530 = vmatpush.msra.mxu2 %v373_v25  ;;  %v555_v4 = vld [vmem:[#allocation3 + $0x1a0] sm:$0xff] }
  0x26   :  { %591 = vmatpush.msrb.mxu3 %v573_v12  ;;  %502 = vmatpush.msrb.mxu1 %v370_v34  ;;  %v551_v12 = vld [vmem:[#allocation3 + $0x180] sm:$0xff] }
  0x27   :  { %620 = vmatpush.msra.mxu0 %v574_v13  ;;  %531 = vmatpush.msra.mxu2 %v371_v35  ;;  %v552_v13 = vld [vmem:[#allocation3 + $0x188] sm:$0xff] }
  0x28   :  { %592 = vmatpush.msrb.mxu3 %v571_v16  ;;  %503 = vmatpush.msrb.mxu1 %v368_v39 }
  0x29   :  { %983 = vmatmul.msk.f32.gmra.mxu1 %vm184_vm1, %v144_v43  ;;  %621 = vmatpush.msra.mxu0 %v572_v17  ;;  %v563_v43 = vld [vmem:[#allocation3 + $0x1e0] sm:$0xff] }
  0x2a   :  { %593 = vmatpush.msrb.mxu3 %v569_v21  ;;  %532 = vmatpush.msra.mxu2 %v369_v41 }
  0x2b   :  { %989 = vmatmul.msk.f32.gmra.mxu2 %vm184_vm1, %v180_v46  ;;  %622 = vmatpush.msra.mxu0 %v570_v23  ;;  %v366_v46 = vld [vmem:[#allocation3 + $0x30] sm:$0xff]  ;;  %vm954_vm1 = vcmask 8192  }
  0x2c   :  { %594 = vmatpush.msrb.mxu3 %v567_v28  ;;  %504 = vmatpush.msrb.mxu1 %v366_v46 }
  0x2d   :  { %623 = vmatpush.msra.mxu0 %v568_v30  ;;  %533 = vmatpush.msra.mxu2 %v367_v47 }
  0x2e   :  { %595 = vmatpush.msrb.mxu3 %v565_v37  ;;  %505 = vmatpush.msrb.mxu1 %v364_v51 }
  0x2f   :  { %624 = vmatpush.msra.mxu0 %v566_v38  ;;  %534 = vmatpush.msra.mxu2 %v365_v52 }
  0x30   :  { %596 = vmatpush.msrb.mxu3 %v563_v43  ;;  %506 = vmatpush.msrb.mxu1 %v362_v57  ;;  %v1028_v57 = vld [vmem:[%s1607_s6] ss:$0 sm:$0xff] }
  0x31   :  { %625 = vmatpush.msra.mxu0 %v564_v45  ;;  %535 = vmatpush.msra.mxu2 %v363_v58  ;;  %v1029_v58 = vld [vmem:[%s1608_s7] ss:$0 sm:$0xff] }
  0x32   :  { %597 = vmatpush.msrb.mxu3 %v561_v48  ;;  %507 = vmatpush.msrb.mxu1 %v360_v63 }
  0x33   :  { %626 = vmatpush.msra.mxu0 %v562_v50  ;;  %536 = vmatpush.msra.mxu2 %v361_v0 }
  0x34   :  { %598 = vmatpush.msrb.mxu3 %v559_v54 }
  0x35   :  { %627 = vmatpush.msra.mxu0 %v560_v55 }
  0x36   :  { %599 = vmatpush.msrb.mxu3 %v557_v59 }
  0x37   :  { %628 = vmatpush.msra.mxu0 %v558_v62 }
  0x38   :  { %600 = vmatpush.msrb.mxu3 %v555_v4 }
  0x39   :  { %629 = vmatpush.msra.mxu0 %v556_v5 }
  0x3a   :  { %601 = vmatpush.msrb.mxu3 %v553_v7 }
  0x3b   :  { %630 = vmatpush.msra.mxu0 %v554_v8 }
  0x3c   :  { %602 = vmatpush.msrb.mxu3 %v551_v12 }
  0x3d   :  { %631 = vmatpush.msra.mxu0 %v552_v13 }
  0x82   :  { %v773_v59 = vpop.permute.xlu0 %772 }
  0x89   :  { %v218_v22 = vpop.f32.mrf.mxu0 }
  0x8e   :  { %v262_v26 = vpop.f32.mrf.mxu1  ;;  %v1281_v32 = vpop.f32.mrf.mxu2 }
  0x8f   :  { %v263_v49 = vadd.f32 %v262_v26, %v218_v22 }
  0x91   :  { %v221_v56 = vpop.f32.mrf.mxu0 }
  0x96   :  { %v265_v60 = vpop.f32.mrf.mxu1  ;;  %v308_v61 = vpop.f32.mrf.mxu2 }
  0x97   :  { %v320_v1 = vadd.f32 %v308_v61, %v263_v49  ;;  %v266_v11 = vadd.f32 %v265_v60, %v221_v56  ;;  %v778_v60 = vmul.f32 %v1028_v57, %v773_v59 }
  0x99   :  { %v328_v6 = vadd.f32 %v1027_v53, %v320_v1  ;;  %v224_v17 = vpop.f32.mrf.mxu0  ;;  %v783_v61 = vadd.f32 %v1029_v58, %v778_v60 }
  0x9b   :  { %v1286_v9 = vmax.f32 %v328_v6, 0.0  ;;  %v784_v62 = vmax.f32 %v783_v61, 0.0 }
  0x9d   :  { %990 = vmatmul.msk.f32.vlgmr.msra.gmra.mxu3 %vm409_vm8, %v1286_v9  ;;  %994 = vmatmul.msk.f32.vlgmr.msrb.gmra.mxu0 %vm409_vm8, %v1286_v9  ;;  %v336_v38 = vrot.slane %v1286_v9, 7  ;;  %v348_v45 = vrot.slane %v1286_v9, 1 }
  0x9e   :  { %v311_v14 = vpop.f32.mrf.mxu2  ;;  %v268_v16 = vpop.f32.mrf.mxu1  ;;  %795 = vrot.lane.b32.xlu0 %v784_v62, %s1088_s13  ;;  %v805_v62 = vld [vmem:[%s1609_s8 + $0x30] sm:$0xff] }
  0x9f   :  { %v321_v15 = vadd.f32 %v311_v14, %v266_v11  ;;  %v269_v21 = vadd.f32 %v268_v16, %v224_v17  ;;  %v814_v11 = vld [vmem:[%s1609_s8 + $0x78] sm:$0xff]  ;;  %v653_v14 = vld [vmem:[%s1606_s5] sm:$0x3]  ;;  %v812_v17 = vld [vmem:[%s1609_s8 + $0x68] sm:$0xff] }
  0xa0   :  { %834 = vmatpush.msra.mxu1 %v814_v11  ;;  %v803_v11 = vld [vmem:[%s1609_s8 + $0x20] sm:$0xff] }
  0xa1   :  { %v329_v19 = vadd.f32 %v1027_v53, %v321_v15  ;;  %v813_v15 = vld [vmem:[%s1609_s8 + $0x70] sm:$0xff] }
  0xa2   :  { %835 = vmatpush.msra.mxu1 %v813_v15 }
  0xa3   :  { %v333_v20 = vmax.f32 %v329_v19, 0.0 }
  0xa4   :  { %836 = vmatpush.msra.mxu1 %v812_v17 }
  0xa5   :  { %991 = vmatmul.msk.f32.gmra.mxu3 %vm409_vm8, %v333_v20  ;;  %995 = vmatmul.msk.f32.gmra.mxu0 %vm409_vm8, %v333_v20  ;;  %v349_v43 = vrot.slane %v333_v20, 1  ;;  %v337_v47 = vrot.slane %v333_v20, 7  ;;  %v1367_v20 = vperm.slane %v653_v14, 1 }
  0xa6   :  { %v314_v22 = vpop.f32.mrf.mxu2  ;;  %v271_v25 = vpop.f32.mrf.mxu1 }
  0xa7   :  { %v322_v23 = vadd.f32 %v314_v22, %v269_v21  ;;  %v272_v28 = vadd.f32 %v271_v25, %v1281_v32  ;;  %v354_v46 = vsel %vm164_vm4, %v348_v45, %v349_v43  ;;  %v342_v10 = vsel %vm143_vm2, %v336_v38, %v337_v47  ;;  %v811_v22 = vld [vmem:[%s1609_s8 + $0x60] sm:$0xff]  ;;  %v826_v25 = vld [vmem:[%s1609_s8 + $0xd8] sm:$0xff] }
  0xa8   :  { %837 = vmatpush.msra.mxu1 %v811_v22  ;;  %858 = vmatpush.msrb.mxu2 %v826_v25 }
  0xa9   :  { %v330_v24 = vadd.f32 %v1027_v53, %v322_v23 }
  0xab   :  { %v334_v26 = vmax.f32 %v330_v24, 0.0 }
  0xad   :  { %992 = vmatmul.msk.f32.gmra.mxu3 %vm409_vm8, %v334_v26  ;;  %996 = vmatmul.msk.f32.gmra.mxu0 %vm409_vm8, %v334_v26  ;;  %v350_v48 = vrot.slane %v334_v26, 1  ;;  %v338_v50 = vrot.slane %v334_v26, 7  ;;  %v810_v26 = vld [vmem:[%s1609_s8 + $0x58] sm:$0xff] }
  0xae   :  { %v317_v30 = vpop.f32.mrf.mxu2  ;;  %838 = vmatpush.msra.mxu1 %v810_v26  ;;  %v801_v26 = vld [vmem:[%s1609_s8 + $0x10] sm:$0xff] }
  0xaf   :  { %v323_v34 = vadd.f32 %v317_v30, %v272_v28  ;;  %v353_v49 = vsel %vm164_vm4, %v349_v43, %v350_v48  ;;  %v341_v52 = vsel %vm143_vm2, %v337_v47, %v338_v50  ;;  %v824_v43 = vld [vmem:[%s1609_s8 + $0xc8] sm:$0xff] }
  0xb0   :  { %v357_v51 = vsel %vm1233_vm5, 0.0, %v353_v49 }
  0xb1   :  { %v331_v35 = vadd.f32 %v1027_v53, %v323_v34  ;;  %v346_v53 = vsel %vm1245_vm6, 0.0, %v341_v52  ;;  %v807_v52 = vld [vmem:[%s1609_s8 + $0x40] sm:$0xff] }
  0xb3   :  { %v335_v37 = vmax.f32 %v331_v35, 0.0  ;;  %v1379_v35 = vperm.slane %v653_v14, 0 }
  0xb5   :  { %993 = vmatmul.msk.f32.gmra.mxu3 %vm409_vm8, %v335_v37  ;;  %997 = vmatmul.msk.f32.gmra.mxu0 %vm409_vm8, %v335_v37  ;;  %v339_v39 = vrot.slane %v335_v37, 7  ;;  %v351_v54 = vrot.slane %v335_v37, 1 }
  0xb7   :  { %v343_v41 = vsel %vm143_vm2, %v339_v39, %v336_v38  ;;  %v352_v55 = vsel %vm164_vm4, %v350_v48, %v351_v54  ;;  %v340_v31 = vsel %vm143_vm2, %v338_v50, %v339_v39  ;;  %v355_v36 = vsel %vm164_vm4, %v351_v54, %v348_v45  ;;  %v825_v38 = vld [vmem:[%s1609_s8 + $0xd0] sm:$0xff]  ;;  %v808_v45 = vld [vmem:[%s1609_s8 + $0x48] sm:$0xff] }
  0xb8   :  { %v344_v32 = vsel %vm1199_vm3, 0.0, %v343_v41  ;;  %v359_v56 = vsel %vm1268_vm7, 0.0, %v355_v36  ;;  %v809_v39 = vld [vmem:[%s1609_s8 + $0x50] sm:$0xff]  ;;  %859 = vmatpush.msrb.mxu2 %v825_v38 }
  0xb9   :  { %998 = vmatmul.msk.f32.vlgmr.msrb.gmra.mxu1 %vm409_vm8, %v344_v32  ;;  %1002 = vmatmul.msk.f32.vlgmr.msra.gmra.mxu2 %vm409_vm8, %v344_v32 }
  0xba   :  { %839 = vmatpush.msra.mxu1 %v809_v39  ;;  %860 = vmatpush.msrb.mxu2 %v824_v43 }
  0xbc   :  { %840 = vmatpush.msra.mxu1 %v808_v45 }
  0xbd   :  { %1006 = vmatmul.msk.f32.vlgmr.msrb.gmra.mxu3 %vm409_vm8, %v354_v46  ;;  %1010 = vmatmul.msk.f32.vlgmr.msra.gmra.mxu0 %vm409_vm8, %v354_v46 }
  0xbe   :  { %841 = vmatpush.msra.mxu1 %v807_v52 }
  0xc1   :  { %999 = vmatmul.msk.f32.gmra.mxu1 %vm409_vm8, %v342_v10  ;;  %1003 = vmatmul.msk.f32.gmra.mxu2 %vm409_vm8, %v342_v10 }
  0xc5   :  { %1007 = vmatmul.msk.f32.gmra.mxu3 %vm409_vm8, %v357_v51  ;;  %1011 = vmatmul.msk.f32.gmra.mxu0 %vm409_vm8, %v357_v51  ;;  %v823_v51 = vld [vmem:[%s1609_s8 + $0xc0] sm:$0xff] }
  0xc6   :  { %861 = vmatpush.msrb.mxu2 %v823_v51 }
  0xc9   :  { %1000 = vmatmul.msk.f32.gmra.mxu1 %vm409_vm8, %v346_v53  ;;  %1004 = vmatmul.msk.f32.gmra.mxu2 %vm409_vm8, %v346_v53 }
  0xcd   :  { %1008 = vmatmul.msk.f32.gmra.mxu3 %vm409_vm8, %v352_v55  ;;  %1012 = vmatmul.msk.f32.gmra.mxu0 %vm409_vm8, %v352_v55  ;;  %v822_v55 = vld [vmem:[%s1609_s8 + $0xb8] sm:$0xff] }
  0xce   :  { %862 = vmatpush.msrb.mxu2 %v822_v55  ;;  %v815_v55 = vld [vmem:[%s1609_s8 + $0x80] sm:$0xff] }
  0xd1   :  { %1001 = vmatmul.msk.f32.gmra.mxu1 %vm409_vm8, %v340_v31  ;;  %1005 = vmatmul.msk.f32.gmra.mxu2 %vm409_vm8, %v340_v31  ;;  %v806_v31 = vld [vmem:[%s1609_s8 + $0x38] sm:$0xff] }
  0xd2   :  { %842 = vmatpush.msra.mxu1 %v806_v31 }
  0xd4   :  { %843 = vmatpush.msra.mxu1 %v805_v62 }
  0xd5   :  { %1009 = vmatmul.msk.f32.gmra.mxu3 %vm409_vm8, %v359_v56  ;;  %1013 = vmatmul.msk.f32.gmra.mxu0 %vm409_vm8, %v359_v56 }
 0x11a   :  { %v468_v44 = vpop.f32.mrf.mxu0 }
 0x120   :  { %v439_v63 = vpop.f32.mrf.mxu3 }
 0x122   :  { %v471_v0 = vpop.f32.mrf.mxu0 }
 0x128   :  { %v442_v1 = vpop.f32.mrf.mxu3 }
 0x12a   :  { %v1347_v4 = vpop.f32.mrf.mxu0 }
 0x130   :  { %v1349_v5 = vpop.f32.mrf.mxu3 }
 0x132   :  { %v1351_v6 = vpop.f32.mrf.mxu0 }
 0x136   :  { %v509_v7 = vpop.f32.mrf.mxu1 }
 0x137   :  { %v510_v24 = vadd.f32 %v509_v7, %v439_v63  ;;  %v804_v63 = vld [vmem:[%s1609_s8 + $0x28] sm:$0xff] }
 0x138   :  { %v1353_v8 = vpop.f32.mrf.mxu3  ;;  %844 = vmatpush.msra.mxu1 %v804_v63  ;;  %v130_v63 = vand.u32 1, %v96_v42 }
 0x13a   :  { %v633_v9 = vpop.f32.mrf.mxu0  ;;  %845 = vmatpush.msra.mxu1 %v803_v11  ;;  %vm134_vm13 = vcmp.eq.s32.totalorder %v130_v63, 0 }
 0x13c   :  { %v538_v12 = vpop.f32.mrf.mxu2 }
 0x13d   :  { %v539_v13 = vadd.f32 %v538_v12, %v468_v44  ;;  %v821_v44 = vld [vmem:[%s1609_s8 + $0xb0] sm:$0xff]  ;;  %v819_v12 = vld [vmem:[%s1609_s8 + $0xa0] sm:$0xff] }
 0x13e   :  { %v512_v16 = vpop.f32.mrf.mxu1  ;;  %863 = vmatpush.msrb.mxu2 %v821_v44 }
 0x13f   :  { %v646_v19 = vadd.f32 %v633_v9, %v539_v13  ;;  %v513_v41 = vadd.f32 %v512_v16, %v442_v1  ;;  %v1445_v13 = vand.u32 1, %v75_v3 }
 0x140   :  { %v604_v21 = vpop.f32.mrf.mxu3 }
 0x141   :  { %v660_v28 = vadd.f32 %v1367_v20, %v646_v19  ;;  %v645_v34 = vadd.f32 %v604_v21, %v510_v24  ;;  %v802_v19 = vld [vmem:[%s1609_s8 + $0x18] sm:$0xff]  ;;  %vm131_vm9 = vcmp.eq.s32.totalorder %v1445_v13, 0 }
 0x142   :  { %v636_v23 = vpop.f32.mrf.mxu0  ;;  %v818_v21 = vld [vmem:[%s1609_s8 + $0x98] sm:$0xff]  ;;  %846 = vmatpush.msra.mxu1 %v802_v19 }
 0x143   :  { %v1393_v46 = vmax.f32 %v660_v28, 0.0  ;;  %v659_v48 = vadd.f32 %v1379_v35, %v645_v34  ;;  %v817_v28 = vld [vmem:[%s1609_s8 + $0x90] sm:$0xff]  ;;  %v886_v13 = vld [vmem:[%s1611_s10 + $0x58] sm:$0xff] }
 0x144   :  { %v541_v30 = vpop.f32.mrf.mxu2  ;;  %847 = vmatpush.msra.mxu1 %v801_v26 }
 0x145   :  { %v542_v37 = vadd.f32 %v541_v30, %v471_v0  ;;  %v676_v36 = vrot.slane %v1393_v46, 1  ;;  %v1413_v58 = vmax.f32 %v659_v48, 0.0  ;;  %v820_v0 = vld [vmem:[%s1609_s8 + $0xa8] sm:$0xff]  ;;  %v128_v30 = vand.u32 1, %v82_v27 }
 0x146   :  { %v515_v49 = vpop.f32.mrf.mxu1  ;;  %864 = vmatpush.msrb.mxu2 %v820_v0 }
 0x147   :  { %v648_v32 = vadd.f32 %v636_v23, %v542_v37  ;;  %vm132_vm10 = vcmp.eq.s32.totalorder %v128_v30, 0 }
 0x148   :  { %v607_v47 = vpop.f32.mrf.mxu3  ;;  %865 = vmatpush.msrb.mxu2 %v819_v12 }
 0x149   :  { %v662_v10 = vadd.f32 %v1367_v20, %v648_v32  ;;  %v647_v50 = vadd.f32 %v607_v47, %v513_v41  ;;  %v800_v41 = vld [vmem:[%s1609_s8 + $0x8] sm:$0xff] }
 0x14a   :  { %v639_v56 = vpop.f32.mrf.mxu0  ;;  %866 = vmatpush.msrb.mxu2 %v818_v21  ;;  %v816_v32 = vld [vmem:[%s1609_s8 + $0x88] sm:$0xff]  ;;  %848 = vmatpush.msra.mxu1 %v800_v41  ;;  %v885_v21 = vld [vmem:[%s1611_s10 + $0x50] sm:$0xff] }
 0x14b   :  { %v1403_v53 = vmax.f32 %v662_v10, 0.0  ;;  %v661_v54 = vadd.f32 %v1379_v35, %v647_v50 }
 0x14c   :  { %v544_v57 = vpop.f32.mrf.mxu2  ;;  %867 = vmatpush.msrb.mxu2 %v817_v28  ;;  %v884_v28 = vld [vmem:[%s1611_s10 + $0x48] sm:$0xff] }
 0x14d   :  { %v678_v59 = vrot.slane %v1403_v53, 1  ;;  %v1416_v60 = vmax.f32 %v661_v54, 0.0  ;;  %v545_v61 = vadd.f32 %v544_v57, %v1347_v4  ;;  %v516_v4 = vadd.f32 %v515_v49, %v1349_v5  ;;  %v799_v54 = vld [vmem:[%s1609_s8] sm:$0xff] }
 0x14e   :  { %v675_v5 = vrot.slane %v1413_v58, 1  ;;  %v518_v24 = vpop.f32.mrf.mxu1  ;;  %868 = vmatpush.msrb.mxu2 %v816_v32  ;;  %849 = vmatpush.msra.mxu1 %v799_v54  ;;  %v883_v32 = vld [vmem:[%s1611_s10 + $0x40] sm:$0xff] }
 0x14f   :  { %v688_v1 = vsel %vm164_vm4, %v676_v36, %v678_v59  ;;  %v677_v7 = vrot.slane %v1416_v60, 1  ;;  %v650_v9 = vadd.f32 %v639_v56, %v545_v61  ;;  %v519_v27 = vadd.f32 %v518_v24, %v1353_v8  ;;  %v888_v61 = vld [vmem:[%s1611_s10 + $0x68] sm:$0xff] }
 0x150   :  { %v692_v14 = vsub.f32 %v1393_v46, %v688_v1  ;;  %v610_v15 = vpop.f32.mrf.mxu3  ;;  %v1492_v8 = vand.u32 1, %v89_v33  ;;  %869 = vmatpush.msrb.mxu2 %v815_v55 }
 0x151   :  { %v664_v16 = vadd.f32 %v1367_v20, %v650_v9  ;;  %v649_v17 = vadd.f32 %v610_v15, %v516_v4  ;;  %v687_v22 = vsel %vm164_vm4, %v675_v5, %v677_v7  ;;  %v887_v4 = vld [vmem:[%s1611_s10 + $0x60] sm:$0xff] }
 0x152   :  { %v700_v3 = vand.u32 2147483647, %v692_v14  ;;  %v691_v18 = vsub.f32 %v1413_v58, %v687_v22  ;;  %v642_v43 = vpop.f32.mrf.mxu0  ;;  %vm133_vm12 = vcmp.eq.s32.totalorder %v1492_v8, 0 }
 0x153   :  { %v1460_v23 = vmax.f32 %v664_v16, 0.0  ;;  %v663_v25 = vadd.f32 %v1379_v35, %v649_v17 }
 0x154   :  { %v547_v34 = vpop.f32.mrf.mxu2  ;;  %v716_v48 = vsel %vm131_vm9, %v700_v3, 0.0  ;;  %v699_v31 = vand.u32 2147483647, %v691_v18 }
 0x155   :  { %v680_v37 = vrot.slane %v1460_v23, 1  ;;  %v1473_v38 = vmax.f32 %v663_v25, 0.0  ;;  %v548_v39 = vadd.f32 %v547_v34, %v1351_v6  ;;  %v724_v33 = vadd.f32 %v716_v48, %v1393_v46 }
 0x157   :  { %v686_v45 = vsel %vm164_vm4, %v678_v59, %v680_v37  ;;  %v679_v6 = vrot.slane %v1473_v38, 1  ;;  %v652_v47 = vadd.f32 %v642_v43, %v548_v39  ;;  %v889_v59 = vld [vmem:[%s1611_s10 + $0x70] sm:$0xff]  ;;  %v739_v11 = vsel %vm738_vm11, %v724_v33, 0.0 }
 0x158   :  { %v694_v10 = vsub.f32 %v1403_v53, %v686_v45  ;;  %v613_v49 = vpop.f32.mrf.mxu3  ;;  %899 = vmatpush.msra.mxu3 %v889_v59 }
 0x159   :  { %v685_v50 = vsel %vm164_vm4, %v677_v7, %v679_v6  ;;  %v666_v51 = vadd.f32 %v1367_v20, %v652_v47  ;;  %v651_v52 = vadd.f32 %v613_v49, %v519_v27  ;;  %v715_v7 = vsel %vm131_vm9, %v699_v31, 0.0 }
 0x15a   :  { %v702_v56 = vand.u32 2147483647, %v694_v10  ;;  %v693_v29 = vsub.f32 %v1416_v60, %v685_v50  ;;  %900 = vmatpush.msra.mxu3 %v888_v61  ;;  %v723_v19 = vadd.f32 %v715_v7, %v1413_v58  ;;  %v881_v50 = vld [vmem:[%s1611_s10 + $0x30] sm:$0xff] }
 0x15b   :  { %v674_v57 = vmax.f32 %v666_v51, 0.0  ;;  %v665_v20 = vadd.f32 %v1379_v35, %v651_v52 }
 0x15c   :  { %v701_v62 = vand.u32 2147483647, %v693_v29  ;;  %v718_v44 = vsel %vm132_vm10, %v702_v56, 0.0  ;;  %901 = vmatpush.msra.mxu3 %v887_v4  ;;  %v796_v4 = vpop.permute.xlu0 %795 }
 0x15d   :  { %v682_v0 = vrot.slane %v674_v57, 1  ;;  %v673_v1 = vmax.f32 %v665_v20, 0.0  ;;  %v726_v35 = vadd.f32 %v718_v44, %v1403_v53 }
 0x15e   :  { %v717_v9 = vsel %vm132_vm10, %v701_v62, 0.0  ;;  %902 = vmatpush.msra.mxu3 %v886_v13  ;;  %v880_v13 = vld [vmem:[%s1611_s10 + $0x28] sm:$0xff] }
 0x15f   :  { %v684_v40 = vsel %vm164_vm4, %v680_v37, %v682_v0  ;;  %v690_v42 = vsel %vm164_vm4, %v682_v0, %v676_v36  ;;  %v681_v53 = vrot.slane %v673_v1, 1  ;;  %v740_v12 = vsel %vm738_vm11, %v726_v35, 0.0 }
 0x160   :  { %v696_v14 = vsub.f32 %v1460_v23, %v684_v40  ;;  %v698_v15 = vsub.f32 %v674_v57, %v690_v42  ;;  %v741_v16 = vadd.f32 %v740_v12, %v739_v11  ;;  %v725_v17 = vadd.f32 %v717_v9, %v1416_v60  ;;  %903 = vmatpush.msra.mxu3 %v885_v21 }
 0x161   :  { %v683_v46 = vsel %vm164_vm4, %v679_v6, %v681_v53  ;;  %v689_v36 = vsel %vm164_vm4, %v681_v53, %v675_v5 }
 0x162   :  { %v704_v3 = vand.u32 2147483647, %v696_v14  ;;  %v706_v22 = vand.u32 2147483647, %v698_v15  ;;  %v695_v60 = vsub.f32 %v1473_v38, %v683_v46  ;;  %v697_v24 = vsub.f32 %v673_v1, %v689_v36  ;;  %904 = vmatpush.msra.mxu3 %v884_v28  ;;  %v879_v14 = vld [vmem:[%s1611_s10 + $0x20] sm:$0xff]  ;;  %v878_v15 = vld [vmem:[%s1611_s10 + $0x18] sm:$0xff] }
 0x163   :  { %v742_v25 = vrot.slane %v741_v16, 4  ;;  %v731_v26 = vadd.f32 %v725_v17, %v723_v19  ;;  %v876_v17 = vld [vmem:[%s1611_s10 + $0x8] sm:$0xff]  ;;  %v875_v46 = vld [vmem:[%s1611_s10] sm:$0xff] }
 0x164   :  { %v722_v2 = vsel %vm134_vm13, %v706_v22, 0.0  ;;  %v703_v5 = vand.u32 2147483647, %v695_v60  ;;  %v705_v58 = vand.u32 2147483647, %v697_v24  ;;  %v720_v30 = vsel %vm133_vm12, %v704_v3, 0.0  ;;  %905 = vmatpush.msra.mxu3 %v883_v32 }
 0x165   :  { %v730_v34 = vadd.f32 %v722_v2, %v674_v57  ;;  %v728_v37 = vadd.f32 %v720_v30, %v1460_v23  ;;  %v743_v39 = vadd.f32 %v742_v25, %v741_v16  ;;  %v732_v41 = vrot.slane %v731_v26, 4  ;;  %v882_v23 = vld [vmem:[%s1611_s10 + $0x38] sm:$0xff]  ;;  %v877_v16 = vld [vmem:[%s1611_s10 + $0x10] sm:$0xff]  ;;  %v1030_v36 = vld [vmem:[%s1610_s9] ss:$0 sm:$0xff] }
 0x166   :  { %v719_v18 = vsel %vm133_vm12, %v703_v5, 0.0  ;;  %v721_v27 = vsel %vm134_vm13, %v705_v58, 0.0  ;;  %906 = vmatpush.msra.mxu3 %v882_v23  ;;  %v920_v24 = vld [vmem:[#allocation2] sm:$0x1] }
 0x167   :  { %v727_v43 = vadd.f32 %v719_v18, %v1473_v38  ;;  %v729_v45 = vadd.f32 %v721_v27, %v673_v1  ;;  %v744_v6 = vrot.slane %v743_v39, 2  ;;  %v755_v47 = vsel %vm738_vm11, %v728_v37, 0.0  ;;  %923 = vperm.xlu1 %1026, %v920_v24   ;;  %v1031_v25 = vld [vmem:[%s1612_s11] ss:$0 sm:$0xff] }
 0x168   :  { %v756_v48 = vsel %vm738_vm11, %v730_v34, 0.0  ;;  %v733_v10 = vadd.f32 %v732_v41, %v731_v26  ;;  %907 = vmatpush.msra.mxu3 %v881_v50  ;;  %v919_v5 = vld [vmem:[%s1613_s12] sm:$0x1] }
 0x169   :  { %v748_v49 = vadd.f32 %v729_v45, %v727_v43  ;;  %v757_v8 = vadd.f32 %v756_v48, %v755_v47  ;;  %v745_v52 = vadd.f32 %v744_v6, %v743_v39 }
 0x16a   :  { %v734_v51 = vrot.slane %v733_v10, 2  ;;  %908 = vmatpush.msra.mxu3 %v880_v13 }
 0x16b   :  { %v749_v38 = vrot.slane %v748_v49, 4  ;;  %v758_v54 = vrot.slane %v757_v8, 4  ;;  %v746_v29 = vrot.slane %v745_v52, 1 }
 0x16c   :  { %v735_v55 = vadd.f32 %v734_v51, %v733_v10  ;;  %909 = vmatpush.msra.mxu3 %v879_v14 }
 0x16d   :  { %v750_v31 = vadd.f32 %v749_v38, %v748_v49  ;;  %v759_v56 = vadd.f32 %v758_v54, %v757_v8  ;;  %v747_v62 = vadd.f32 %v746_v29, %v745_v52 }
 0x16e   :  { %v736_v57 = vrot.slane %v735_v55, 1  ;;  %910 = vmatpush.msra.mxu3 %v878_v15 }
 0x16f   :  { %v760_v33 = vrot.slane %v759_v56, 2  ;;  %v751_v20 = vrot.slane %v750_v31, 2  ;;  %v765_v7 = vmul.f32 0.0625, %v747_v62 }
 0x170   :  { %v737_v63 = vadd.f32 %v736_v57, %v735_v55  ;;  %911 = vmatpush.msra.mxu3 %v877_v16 }
 0x171   :  { %v761_v59 = vadd.f32 %v760_v33, %v759_v56  ;;  %v752_v61 = vadd.f32 %v751_v20, %v750_v31 }
 0x172   :  { %v764_v11 = vmul.f32 0.0625, %v737_v63  ;;  %912 = vmatpush.msra.mxu3 %v876_v17 }
 0x173   :  { %v762_v44 = vrot.slane %v761_v59, 1  ;;  %v753_v0 = vrot.slane %v752_v61, 1 }
 0x174   :  { %913 = vmatpush.msra.mxu3 %v875_v46 }
 0x175   :  { %v763_v1 = vadd.f32 %v762_v44, %v761_v59  ;;  %v754_v35 = vadd.f32 %v753_v0, %v752_v61 }
 0x177   :  { %v767_v9 = vmul.f32 0.0625, %v763_v1  ;;  %v766_v40 = vmul.f32 0.0625, %v754_v35 }
 0x179   :  { %v791_v42 = vsel %vm789_vm14, %v767_v9, %v765_v7  ;;  %v790_v53 = vsel %vm789_vm14, %v766_v40, %v764_v11 }
 0x17a   :  { %v798_v12 = vsel %vm738_vm11, %v791_v42, %v796_v4  ;;  %850 = vmatmul.f32.vlgmr.msra.gmra.mxu1 %v790_v53 }
 0x17b   :  { %1014 = vmatmul.msk.f32.vlgmr.msrb.gmra.mxu2 %vm409_vm8, %v798_v12 }
 0x1d9   :  { %v924_v58 = vpop.permute.xlu1 %923 }
 0x1da   :  { %v926_v30 = vperm.slane %v924_v58, 0 }
 0x1f7   :  { %v851_v19 = vpop.f32.mrf.mxu1 }
 0x1f8   :  { %v852_v21 = vadd.f32 %v1030_v36, %v851_v19 }
 0x1fe   :  { %v871_v3 = vpop.f32.mrf.mxu2 }
 0x1ff   :  { %v872_v22 = vadd.f32 %v871_v3, %v852_v21 }
 0x201   :  { %v874_v60 = vmax.f32 %v872_v22, 0.0 }
 0x203   :  { %1015 = vmatmul.msk.f32.vlgmr.msra.gmra.mxu3 %vm894_vm15, %v874_v60 }
 0x286   :  { %v915_v26 = vpop.f32.mrf.mxu3 }
 0x287   :  { %v916_v28 = vadd.f32 %v1031_v25, %v915_v26 }
 0x289   :  { %v918_v2 = vmax.f32 %v916_v28, 0.0 }
 0x28b   :  { %1016 = vmatpush.xpose.msk.msrb.mxu1 %vm927_vm0, %v918_v2 }
 0x28e   :  { %1017 = vmatmul.msk.f32.vlgmr.msrb.gmra.mxu1 %vm927_vm0, %v919_v5 }
 0x30b   :  { %v951_v34 = vpop.f32.mrf.mxu1 }
 0x30c   :  { %v952_v37 = vadd.f32 %v951_v34, %v926_v30 }
 0x30e   :  { %955 = vst.msk [vmem:[#allocation6] sm:$0x1] %vm954_vm1, %v952_v37 }
 0x30f   :  { %966 = dma.vmem_to_hbm [thread:$0]  %s962_s0, 16, %s964_s18, [#allocation5]  }
 0x310   :  { %1082 = dma.done.wait [#allocation5], 16  }
 0x311   :  { %1083 = vsyncadd [#allocation5], 4294967280 }
 0x312   :  { %971 = vsyncpa [#allocation4], 1 }
 0x313   :  { %972 = vsyncpa [#allocation5], 1 }

</bundles_post_ra>
